<compile_context>
chip_gen: v7x
topology: tpu7x:2x2x1
jax: 0.10.0
libtpu: 0.0.40
codegen_flags: <defaults>
</compile_context>

<pallas_src>
import jax
import jax.numpy as jnp
from jax.experimental import pallas as pl
from jax.experimental.pallas import tpu as pltpu


def _swish_kernel(x_ref, o_ref):
    x = x_ref[...]
    # f32 compute for accuracy; cheap since we are HBM-bound on all chips.
    xf = x.astype(jnp.float32)
    o_ref[...] = (xf * jax.nn.sigmoid(xf)).astype(o_ref.dtype)


_LANE_CANDIDATES = (8192, 4096, 2048, 1024, 512, 256, 128)
_VMEM_LIMIT = 32 << 20            # safe on v5e/v6e/v7x; do NOT raise toward 64 MiB
_RAGGED_BLOCK_BYTES = 2 << 20     # ~2 MiB blocks for the 1D ragged path
_RAGGED_BLOCK_ALIGN = 8 * 128 * 4  # full vregs for any dtype down to int8/fp8


def _sublane_multiple(dtype):
    """Rows per packed sublane group: 8 for 32-bit, 16 for 16-bit, 32 for 8-bit."""
    bits = jnp.dtype(dtype).itemsize * 8
    if bits >= 32:
        return 8
    if bits == 16:
        return 16
    return 32


def _swish_flat_ragged(flat):
    """Swish on a flat 1D array whose length is NOT a multiple of 128.

    No padding / slicing copies: either a single full-array VMEM block, or a
    1D grid where Pallas masks the partial trailing block.
    """
    n = flat.shape[0]
    dtype = flat.dtype
    itemsize = jnp.dtype(dtype).itemsize
    block = max(
        _RAGGED_BLOCK_ALIGN,
        ((_RAGGED_BLOCK_BYTES // itemsize) // _RAGGED_BLOCK_ALIGN) * _RAGGED_BLOCK_ALIGN,
    )

    if n <= block:
        # Whole array as one block: trivially legal (block == full dim).
        return pl.pallas_call(
            _swish_kernel,
            out_shape=jax.ShapeDtypeStruct((n,), dtype),
            compiler_params=pltpu.CompilerParams(vmem_limit_bytes=_VMEM_LIMIT),
        )(flat)

    grid = (pl.cdiv(n, block),)
    return pl.pallas_call(
        _swish_kernel,
        out_shape=jax.ShapeDtypeStruct((n,), dtype),
        grid_spec=pltpu.PrefetchScalarGridSpec(
            num_scalar_prefetch=0,
            grid=grid,
            in_specs=[pl.BlockSpec((block,), lambda i: (i,))],
            out_specs=pl.BlockSpec((block,), lambda i: (i,)),
        ),
        compiler_params=pltpu.CompilerParams(
            dimension_semantics=("parallel",),
            vmem_limit_bytes=_VMEM_LIMIT,
        ),
    )(flat)


def swish(x, *, target_block_bytes=2 << 20):
    """Elementwise Swish on an arbitrary-shaped array (NCHW / NCT typical)."""
    orig_shape = x.shape
    orig_dtype = x.dtype
    n = x.size
    if n == 0:
        return x
    itemsize = jnp.dtype(orig_dtype).itemsize
    total_bytes = n * itemsize

    # Widest lane width (multiple of 128) dividing n exactly -> zero-copy 2D view.
    lane = None
    for cand in _LANE_CANDIDATES:
        if n % cand == 0:
            lane = cand
            break

    flat = jnp.ravel(x)  # free reshape for contiguous inputs

    if lane is None:
        # Ragged element count: run directly on the flat 1D array (no copies).
        return _swish_flat_ragged(flat).reshape(orig_shape)

    rows = n // lane
    x2d = flat.reshape(rows, lane)
    sub = _sublane_multiple(orig_dtype)

    # ~target_block_bytes per block.
    target_rows = max(1, (target_block_bytes // itemsize) // lane)
    tile_rows = min(target_rows, rows)

    # v7x megacore: guarantee >= 2 grid steps for tensors bigger than ~2 MiB so
    # the "parallel" axis can shard across both TensorCores (no-op on v5e/v6e).
    if total_bytes > (2 << 20) and rows >= 2 * sub:
        half_rows = pl.cdiv(rows, 2)
        cap = max(sub, pl.cdiv(half_rows, sub) * sub)
        tile_rows = min(tile_rows, cap)

    # Dtype-aware sublane rounding (full-extent blocks are always legal).
    if tile_rows < rows:
        tile_rows = max(sub, (tile_rows // sub) * sub)
        tile_rows = min(tile_rows, rows)

    grid = (pl.cdiv(rows, tile_rows),)

    out2d = pl.pallas_call(
        _swish_kernel,
        out_shape=jax.ShapeDtypeStruct((rows, lane), orig_dtype),
        grid_spec=pltpu.PrefetchScalarGridSpec(
            num_scalar_prefetch=0,
            grid=grid,
            in_specs=[pl.BlockSpec((tile_rows, lane), lambda i: (i, 0))],
            out_specs=pl.BlockSpec((tile_rows, lane), lambda i: (i, 0)),
        ),
        compiler_params=pltpu.CompilerParams(
            dimension_semantics=("parallel",),
            vmem_limit_bytes=_VMEM_LIMIT,
        ),
    )(x2d)
    return out2d.reshape(orig_shape)


if __name__ == "__main__":
    def ref_swish(a):
        af = a.astype(jnp.float32)
        return (af * jax.nn.sigmoid(af)).astype(a.dtype)

    keys = jax.random.split(jax.random.PRNGKey(0), 5)

    # 1) Module-typical NCHW feature map (small, single-block fast path).
    x = jax.random.normal(keys[0], (2, 4, 16, 16), dtype=jnp.float32)
    y = jax.block_until_ready(swish(x))
    assert y.shape == x.shape and y.dtype == x.dtype
    assert jnp.allclose(y, ref_swish(x), atol=1e-5, rtol=1e-5), "mismatch (small aligned)"

    # 2) Larger aligned tensor: multi-step grid (~2 MiB blocks, >= 2 steps).
    xb = jax.random.normal(keys[1], (8, 64, 64, 64), dtype=jnp.float32)
    yb = jax.block_until_ready(swish(xb))
    assert jnp.allclose(yb, ref_swish(xb), atol=1e-5, rtol=1e-5), "mismatch (large aligned)"

    # 3) bf16 activations: exercises dtype-aware sublane rounding (multiple of 16).
    xh = jax.random.normal(keys[2], (8, 64, 64, 64), dtype=jnp.float32).astype(jnp.bfloat16)
    yh = jax.block_until_ready(swish(xh))
    assert jnp.allclose(yh.astype(jnp.float32), ref_swish(xh).astype(jnp.float32),
                        atol=2e-2, rtol=2e-2), "mismatch (bf16)"

    # 4) Small ragged size (not a multiple of 128): single-block 1D path, no copies.
    xr = jax.random.normal(keys[3], (3, 5, 7), dtype=jnp.float32)
    yr = jax.block_until_ready(swish(xr))
    assert jnp.allclose(yr, ref_swish(xr), atol=1e-5, rtol=1e-5), "mismatch (small ragged)"

    # 5) Large ragged size: 1D grid path with a masked partial trailing block.
    xg = jax.random.normal(keys[4], (1031, 1021), dtype=jnp.float32)
    yg = jax.block_until_ready(swish(xg))
    assert jnp.allclose(yg, ref_swish(xg), atol=1e-5, rtol=1e-5), "mismatch (large ragged)"

    print("KERNEL_OK")
</pallas_src>

<mosaic_0001>
module attributes {stable_mosaic.version = 11 : i64} {
  func.func @_swish_kernel(%arg0: i32, %arg1: memref<1x2048xf32, #tpu.memory_space<vmem>>, %arg2: memref<1x2048xf32, #tpu.memory_space<vmem>>) attributes {dimension_semantics = [#tpu.dimension_semantics<parallel>], iteration_bounds = array<i64: 1>, scalar_prefetch = 0 : i64, scratch_operands = 0 : i64, tpu.core_type = #tpu.core_type<tc>, window_params = [{transform_indices = @transform_0, window_bounds = array<i64: 1, 2048>}, {transform_indices = @transform_1, window_bounds = array<i64: 1, 2048>}]} {
    %c0 = arith.constant 0 : index
    %c0_0 = arith.constant 0 : index
    %0 = vector.load %arg1[%c0, %c0_0] : memref<1x2048xf32, #tpu.memory_space<vmem>>, vector<1x2048xf32>
    %1 = arith.negf %0 : vector<1x2048xf32>
    %2 = math.exp %1 : vector<1x2048xf32>
    %cst = arith.constant 1.000000e+00 : f32
    %3 = vector.broadcast %cst : f32 to vector<1x2048xf32>
    %4 = arith.addf %3, %2 : vector<1x2048xf32>
    %5 = arith.divf %3, %4 : vector<1x2048xf32>
    %6 = arith.mulf %0, %5 : vector<1x2048xf32>
    %c0_1 = arith.constant 0 : index
    %c0_2 = arith.constant 0 : index
    %7 = vector.load %arg2[%c0_1, %c0_2] : memref<1x2048xf32, #tpu.memory_space<vmem>>, vector<1x2048xf32>
    tpu.vector_store %arg2[%c0_1, %c0_2], %6 {strides = array<i32>} : memref<1x2048xf32, #tpu.memory_space<vmem>>, vector<1x2048xf32>,
    return
  }
  func.func @transform_0(%arg0: i32) -> (i32, i32) {
    %c0_i32 = arith.constant 0 : i32
    %c0_i32_0 = arith.constant 0 : i32
    return %arg0, %c0_i32 : i32, i32
  }
  func.func @transform_1(%arg0: i32) -> (i32, i32) {
    %c0_i32 = arith.constant 0 : i32
    %c0_i32_0 = arith.constant 0 : i32
    return %arg0, %c0_i32 : i32, i32
  }
}

</mosaic_0001>

<bundles_post_ra>
// kernel: tpu_custom_call.1
= control target key start
LH: loop header
LB: loop body
LE: loop exit
PB: predicated region body
PF: predicated region fallthrough
CT: control target
= control target key end

     0   :  { %6 = vsyncpa [#allocation3], 0  ;;  %s150_s0 = inlined_call_operand.hbm [shape: f32[1,2048], index: 0, kind: input, shape index: {}]   ;;  %s151_s1 = inlined_call_operand.hbm [shape: f32[1,2048], index: 1, kind: output, shape index: {}]  }
   0x1   :  { %7 = vsyncpa [#allocation4], 0  ;;  %s114_s6 = smov [#allocation2]   ;;  %s66_s10 = scalar_lea.hbm %s150_s0, 256 }
   0x2   :  { %s14_s7 = sshll.u32 %s114_s6, 4  ;;  %p67_p0 = scmp.ne.s32.totalorder %s150_s0, %s66_s10  ;;  %s15_s7 = int_to_ptr.vmem [resolvable:$true] %s14_s7 }
   0x3   :  { %p70_p1 = scmp.lt.u32.totalorder %s66_s10, %s150_s0 }
   0x5   :  { %p72_p2 = pnand %p70_p1, %p67_p0 }
   0x7   :  { %75 = shalt.err (!%p72_p2)
}
   0x8   :  { %s76_s15 = scalar_lea.vmem %s15_s7, 256  ;;  %p81_p4 = scmp.lt.s32.totalorder %s15_s7, %s15_s7 }
   0x9   :  { %p77_p3 = scmp.ne.s32.totalorder %s15_s7, %s76_s15  ;;  %p82_p5 = scmp.lt.s32.totalorder %s76_s15, %s76_s15 }
   0xb   :  { %p83_p6 = por %p82_p5, %p81_p4 }
   0xd   :  { %p84_p7 = pnand %p83_p6, %p77_p3 }
   0xf   :  { %87 = shalt.err (!%p84_p7)
}
  0x10   :  { %17 = dma.hbm_to_vmem [thread:$0]  %s150_s0, 256, %s15_s7, [#allocation3]  }
  0x11   :  { %110 = dma.done.wait [#allocation3], 256  }
  0x12   :  { %111 = vsyncadd [#allocation3], 4294967040  ;;  %v21_v0 = vld [vmem:[#allocation2] sm:$0xff]  ;;  %v22_v1 = vld [vmem:[#allocation2 + $0x8] sm:$0xff]  ;;  %s115_s18 = smov [#allocation5]  }
  0x13   :  { %v54_v2 = vmul.f32 -1.442695, %v21_v0  ;;  %v55_v3 = vmul.f32 -1.442695, %v22_v1  ;;  %s45_s19 = sshll.u32 %s115_s18, 4  ;;  %s46_s19 = int_to_ptr.vmem [resolvable:$true] %s45_s19 }
  0x14   :  { %s88_s0 = scalar_lea.vmem %s46_s19, 256  ;;  %p93_p9 = scmp.lt.s32.totalorder %s46_s19, %s46_s19 }
  0x15   :  { %58 = vpow2.f32 %v54_v2  ;;  %p89_p8 = scmp.ne.s32.totalorder %s46_s19, %s88_s0  ;;  %p94_p10 = scmp.lt.s32.totalorder %s88_s0, %s88_s0 }
  0x16   :  { %60 = vpow2.f32 %v55_v3 }
  0x17   :  { %p95_p11 = por %p94_p10, %p93_p9 }
  0x19   :  { %p96_p12 = pnand %p95_p11, %p89_p8 }
  0x1f   :  { %v59_v4 = vpop.eup %58 }
  0x20   :  { %v61_v5 = vpop.eup %60  ;;  %v29_v6 = vadd.f32 1.0, %v59_v4 }
  0x21   :  { %v30_v7 = vadd.f32 1.0, %v61_v5 }
  0x22   :  { %62 = vrcp.f32 %v29_v6 }
  0x23   :  { %64 = vrcp.f32 %v30_v7 }
  0x2c   :  { %v63_v8 = vpop.eup %62 }
  0x2d   :  { %v65_v9 = vpop.eup %64  ;;  %v35_v10 = vmul.f32 %v63_v8, %v21_v0 }
  0x2e   :  { %v36_v11 = vmul.f32 %v65_v9, %v22_v1 }
  0x2f   :  { %37 = vst [vmem:[#allocation5] sm:$0xff] %v35_v10 }
  0x30   :  { %38 = vst [vmem:[#allocation5 + $0x8] sm:$0xff] %v36_v11 }
  0x31   :  { %99 = shalt.err (!%p96_p12)
}
  0x32   :  { %s100_s22 = scalar_lea.hbm %s151_s1, 256 }
  0x33   :  { %p101_p13 = scmp.ne.s32.totalorder %s151_s1, %s100_s22  ;;  %p104_p0 = scmp.lt.u32.totalorder %s100_s22, %s151_s1 }
  0x35   :  { %p106_p1 = pnand %p104_p0, %p101_p13 }
  0x37   :  { %109 = shalt.err (!%p106_p1)
}
  0x38   :  { %48 = dma.vmem_to_hbm [thread:$0]  %s46_s19, 256, %s151_s1, [#allocation4]  }
  0x39   :  { %112 = dma.done.wait [#allocation4], 256  }
  0x3a   :  { %113 = vsyncadd [#allocation4], 4294967040 }
  0x3b   :  { %52 = vsyncpa [#allocation3], 1 }
  0x3c   :  { %53 = vsyncpa [#allocation4], 1 }

</bundles_post_ra>
